<compile_context>
chip_gen: v5e
topology: v5e:2x2
jax: 0.10.0
libtpu: 0.0.40
codegen_flags: <defaults>
</compile_context>

<pallas_src>
import functools
import inspect

import jax
import jax.numpy as jnp
from jax import lax
from jax.experimental import pallas as pl
from jax.experimental.pallas import tpu as pltpu


def _prefpoolb_kernel(x_ref, par_ref, sel_ref, o_ref, *, taps, lv, keep_lo, fuse_hl):
    """Fused max-pool + folded depthwise conv + stride-s downsample.

    x_ref   : (1, rb, L)     rows = (channel, row-group), lanes = flattened G*K*W window
    par_ref : (rb, KK+1)     col 0 = (mb + maxpref[c]), cols 1..KK = folded tap weights
    sel_ref : (Lv, G*Wo)     0/1 selection matrix compacting the stride-s lanes (bf16)
    o_ref   : (1, rb, G*Wo)
    """
    x = x_ref[0].astype(jnp.float32)                      # (rb, L)
    par = par_ref[...].astype(jnp.float32)                # (rb, KK+1)
    scale = par[:, 0:1]
    mx = None
    acc = None
    # TODO(synk): if bundle dumps show the XLU (lane-shift) slot saturating, reuse the
    # shift-by-1 result across the two kernel rows (halves vrot traffic for K=2).
    for kk, d in enumerate(taps):                         # K*K static lane offsets
        v = x[:, d:d + lv]                                # lane-shifted view of tap kk
        w = par[:, kk + 1:kk + 2]                         # (rb, 1)
        if mx is None:
            mx, acc = v, v * w
        else:
            mx = jnp.maximum(mx, v)
            acc = acc + v * w
    full = scale * mx + acc                               # valid at lanes s*(W*i + j)

    # Stride-s lane compaction as a 0/1 selection matmul on the (otherwise idle) MXU.
    sel = sel_ref[...]
    hi = full.astype(jnp.bfloat16)
    if not keep_lo:
        # bf16 output cannot represent the recovered bits -- single bf16 pass suffices.
        out = jnp.dot(hi, sel, preferred_element_type=jnp.float32)
    elif fuse_hl:
        # hi/lo split keeps the compaction exact to ~2^-16 * |full| independent of the
        # MXU's f32 decomposition; one fused matmul pushes `sel` into the MXU only once.
        # (Concatenate in f32 so the sublane join stays tile-aligned for rb % 8 == 0.)
        rb = full.shape[0]
        hl = jnp.concatenate([full, full - hi.astype(jnp.float32)], axis=0)
        prod = jnp.dot(hl.astype(jnp.bfloat16), sel, preferred_element_type=jnp.float32)
        out = prod[:rb] + prod[rb:]
    else:
        lo = (full - hi.astype(jnp.float32)).astype(jnp.bfloat16)
        out = (jnp.dot(hi, sel, preferred_element_type=jnp.float32)
               + jnp.dot(lo, sel, preferred_element_type=jnp.float32))
    o_ref[0] = out.astype(o_ref.dtype)


def _round_up(v, m):
    return -(-v // m) * m


def _pick_row_block(R, L, cap_bytes, sub):
    """Row chunk per grid step: a multiple of `sub` sublanes (or the full R when R is
    small), sized so an f32 working copy of the block stays under ~cap_bytes. Never
    returns a block larger than the cap (ragged last block is allowed instead)."""
    lane_pad = max(128, _round_up(L, 128))
    cap_rows = max(sub, (cap_bytes // (lane_pad * 4)) // sub * sub)
    if R <= cap_rows:
        return R
    rb = cap_rows
    while rb >= sub:                       # prefer an exact divisor (no ragged block)
        if R % rb == 0:
            return rb
        rb -= sub
    return cap_rows                        # ragged last block: Pallas pads/clips it


def _vmem_budget(rb, L, Gout, KK, Lv, in_itemsize, out_itemsize):
    """Scoped-VMEM request derived from the actual buffers (double-buffered blocks plus
    a conservative estimate of in-kernel f32 working copies), clamped to 48 MiB so it
    stays well inside v7x's 64 MiB per-TensorCore VMEM (v5e/v6e have 128 MiB)."""
    lane_L = _round_up(L, 128)
    lane_O = _round_up(Gout, 128)
    rb_pad = _round_up(rb, 8)
    blk_in = rb_pad * lane_L * in_itemsize
    blk_out = rb_pad * lane_O * out_itemsize
    blk_par = rb_pad * 128 * 4
    blk_sel = _round_up(Lv, 16) * lane_O * 2
    temps = 7 * rb_pad * lane_L * 4        # f32 working copies inside the kernel body
    budget = 2 * (blk_in + blk_out + blk_par) + blk_sel + temps
    return int(min(max(budget + (2 << 20), 24 << 20), 48 << 20))


def _single_buffer_kwargs():
    """sel's block index is constant; request a single buffer if the API supports it."""
    try:
        if hasattr(pl, "Buffered") and \
                "pipeline_mode" in inspect.signature(pl.BlockSpec).parameters:
            return {"pipeline_mode": pl.Buffered(1)}
    except (TypeError, ValueError):
        pass
    return {}


def prefpoolb_forward(x_nchw, params, *, stride=2, kernel_size=2, padding=0,
                      block_cap_bytes=4 << 20, target_out_lanes=256):
    maxpref, pconvs, pprefs, mb, pb = params
    # TODO(synk): padding>0 path (MaxPool2d pads with -inf, the conv pads with 0) not
    # implemented; the module default (and _Transition usage) is padding=0.
    assert padding == 0, "only padding=0 (module default) is implemented"
    N, C, H, W = x_nchw.shape
    O = pprefs.shape[0]
    # The PyTorch in-place `out += F.conv2d(...)` requires out_planes == in_planes.
    assert O == C, "torch in-place add requires out_planes == in_planes"
    K, s = kernel_size, stride
    Ho = (H - K) // s + 1
    Wo = (W - K) // s + 1
    KK = K * K
    f32 = jnp.float32
    out_dtype = x_nchw.dtype

    # ---- fold the num_convs branches into one depthwise weight per (tap, channel) ----
    scale_c = (mb + maxpref.reshape(C)).astype(f32)                  # (C,)
    s_conv = jnp.sum(pconvs.astype(f32), axis=-1).reshape(KK)        # sum_c pconvs
    s_b = jnp.sum(pb.astype(f32))                                    # sum_c pb
    s_pref = jnp.sum(pprefs.astype(f32), axis=-1).reshape(C)         # sum_c pprefs
    weff_kkc = s_conv[:, None] + s_b + s_pref[None, :]               # (KK, C)

    # ---- choose the output-row group G so the OUTPUT lane width G*Wo is dense -------
    if K == s and H % K == 0:
        # Non-overlapping windows: a group of G output rows corresponds to G*K
        # contiguous input rows, so grouping is a *free* row-major reshape of x.
        target_G = max(1, -(-target_out_lanes // Wo))        # aim for G*Wo >= 256 lanes
        cands = [g for g in range(1, Ho + 1) if Ho % g == 0 and g >= target_G]
        G = min(cands) if cands else Ho
        n_groups = Ho // G
        L = G * K * W
    else:
        # TODO(synk): overlapping windows (K != s) / ragged H keep the whole per-channel
        # image on lanes and a dense (H*W, Ho*Wo) selection matrix -- small images only.
        G, n_groups, L = Ho, 1, H * W
    Gout = G * Wo
    Lv = L - (K - 1) * (W + 1)                        # common valid length across taps
    assert Lv > 0, "image too small for this kernel layout"
    taps = tuple(ki * W + kj for ki in range(K) for kj in range(K))
    R = C * n_groups                                  # kernel row dimension

    # ---- free reshapes + one tiny per-row parameter table (no extra HBM passes on x) --
    xr = x_nchw.reshape(N, R, L)
    par_c = jnp.concatenate([scale_c[:, None], weff_kkc.T], axis=1)  # (C, KK+1)
    par_rows = jnp.repeat(par_c, n_groups, axis=0) if n_groups > 1 else par_c  # (R,KK+1)
    pos = (s * W) * jnp.arange(G)[:, None] + s * jnp.arange(Wo)[None, :]       # (G, Wo)
    sel = jnp.zeros((Lv, Gout), f32)
    sel = sel.at[pos.reshape(-1), jnp.arange(Gout)].set(1.0).astype(jnp.bfloat16)

    # ---- tiling: large lane-dense blocks, >=2 parallel grid steps for two-TC chips ---
    sub = 16 if jnp.dtype(x_nchw.dtype) == jnp.dtype(jnp.bfloat16) else 8
    rb = _pick_row_block(R, L, block_cap_bytes, sub)
    M = -(-R // rb)
    if N < 2 and M < 2 and R >= 2 * sub:
        rb = max(sub, (R // 2) // sub * sub)          # force >=2 steps (v7x: 2 TCs)
        M = -(-R // rb)

    keep_lo = jnp.dtype(out_dtype) != jnp.dtype(jnp.bfloat16)
    fuse_hl = keep_lo and (rb % 8 == 0)
    kernel = functools.partial(_prefpoolb_kernel, taps=taps, lv=Lv,
                               keep_lo=keep_lo, fuse_hl=fuse_hl)
    vmem_limit = _vmem_budget(rb, L, Gout, KK, Lv,
                              jnp.dtype(x_nchw.dtype).itemsize,
                              jnp.dtype(out_dtype).itemsize)
    sel_kwargs = _single_buffer_kwargs()

    out_flat = pl.pallas_call(
        kernel,
        out_shape=jax.ShapeDtypeStruct((N, R, Gout), out_dtype),
        grid=(N, M),
        in_specs=[
            pl.BlockSpec((1, rb, L), lambda n, m: (n, m, 0)),
            pl.BlockSpec((rb, KK + 1), lambda n, m: (m, 0)),
            pl.BlockSpec((Lv, Gout), lambda n, m: (0, 0), **sel_kwargs),
        ],
        out_specs=pl.BlockSpec((1, rb, Gout), lambda n, m: (n, m, 0)),
        compiler_params=pltpu.CompilerParams(
            dimension_semantics=("parallel", "parallel"),
            vmem_limit_bytes=vmem_limit),
    )(xr, par_rows, sel)

    # (N, C*n_groups, G*Wo) is row-major identical to (N, C, Ho, Wo): free reshape.
    return out_flat.reshape(N, C, Ho, Wo)


def prefpoolb_reference(x, params, *, stride=2, kernel_size=2):
    """Pure-JAX reference matching the PyTorch forward literally (NCHW)."""
    maxpref, pconvs, pprefs, mb, pb = params
    K = kernel_size
    Cin = x.shape[1]
    O = pprefs.shape[0]
    nc = pconvs.shape[-1]
    mp = lax.reduce_window(x, -jnp.inf, lax.max,
                           (1, 1, K, K), (1, 1, stride, stride), "VALID")
    out = (mb + maxpref) * mp
    for c in range(nc):
        pconv = jnp.tile(pconvs[:, :, :, :, c], (O, 1, 1, 1))   # (O,1,K,K)
        ppref = pb[c] + pprefs[:, :, :, :, c]                   # (O,1,1,1)
        w = ppref + pconv
        out = out + lax.conv_general_dilated(
            x, w, (stride, stride), "VALID",
            dimension_numbers=("NCHW", "OIHW", "NCHW"),
            feature_group_count=Cin,
            precision=lax.Precision.HIGHEST)
    return out


if __name__ == "__main__":
    in_planes = out_planes = 8
    N, H, W = 2, 16, 16
    K, stride, nc = 2, 2, 4

    key = jax.random.PRNGKey(0)
    k1, k2, k3, k4, k5, kx = jax.random.split(key, 6)
    maxpref = 0.1 * jax.random.normal(k1, (1, in_planes, 1, 1), jnp.float32)
    pconvs = 0.1 * jax.random.normal(k2, (1, 1, K, K, nc), jnp.float32)
    pprefs = 0.1 * jax.random.normal(k3, (out_planes, 1, 1, 1, nc), jnp.float32)
    mb = 0.1 * jax.random.normal(k4, (1,), jnp.float32)
    pb = 0.1 * jax.random.normal(k5, (nc,), jnp.float32)
    params = (maxpref, pconvs, pprefs, mb, pb)

    x = jax.random.normal(kx, (N, in_planes, H, W), jnp.float32)

    out = prefpoolb_forward(x, params, stride=stride, kernel_size=K, padding=0)
    out = jax.block_until_ready(out)

    ref = prefpoolb_reference(x, params, stride=stride, kernel_size=K)
    assert out.shape == (N, out_planes, H // stride, W // stride), out.shape
    max_err = float(jnp.max(jnp.abs(out - ref)))
    assert max_err < 1e-4, f"mismatch vs reference: {max_err}"
    print("KERNEL_OK")
</pallas_src>

<mosaic_0001>
module attributes {stable_mosaic.version = 11 : i64} {
  func.func @_prefpoolb_kernel(%arg0: i32, %arg1: i32, %arg2: memref<1x8x256xf32, #tpu.memory_space<vmem>>, %arg3: memref<8x5xf32, #tpu.memory_space<vmem>>, %arg4: memref<239x64xbf16, #tpu.memory_space<vmem>>, %arg5: memref<1x8x64xf32, #tpu.memory_space<vmem>>) attributes {dimension_semantics = [#tpu.dimension_semantics<parallel>, #tpu.dimension_semantics<parallel>], iteration_bounds = array<i64: 2, 1>, scalar_prefetch = 0 : i64, scratch_operands = 0 : i64, tpu.core_type = #tpu.core_type<tc>, window_params = [{transform_indices = @transform_0, window_bounds = array<i64: 1, 8, 256>}, {transform_indices = @transform_1, window_bounds = array<i64: 8, 5>}, {pipeline_mode = #tpu.pipeline_mode<synchronous>, transform_indices = @transform_2, window_bounds = array<i64: 239, 64>}, {transform_indices = @transform_3, window_bounds = array<i64: 1, 8, 64>}]} {
    %c0 = arith.constant 0 : index
    %c0_0 = arith.constant 0 : index
    %c0_1 = arith.constant 0 : index
    %0 = vector.load %arg2[%c0, %c0_0, %c0_1] : memref<1x8x256xf32, #tpu.memory_space<vmem>>, vector<1x8x256xf32>
    %1 = vector.shape_cast %0 : vector<1x8x256xf32> to vector<8x256xf32>
    %c0_2 = arith.constant 0 : index
    %c0_3 = arith.constant 0 : index
    %2 = vector.load %arg3[%c0_2, %c0_3] : memref<8x5xf32, #tpu.memory_space<vmem>>, vector<8x5xf32>
    %3 = vector.extract_strided_slice %2 {offsets = [0, 0], sizes = [8, 1], strides = [1, 1]} : vector<8x5xf32> to vector<8x1xf32>
    %4 = vector.extract_strided_slice %1 {offsets = [0, 0], sizes = [8, 239], strides = [1, 1]} : vector<8x256xf32> to vector<8x239xf32>
    %5 = vector.extract_strided_slice %2 {offsets = [0, 1], sizes = [8, 1], strides = [1, 1]} : vector<8x5xf32> to vector<8x1xf32>
    %6 = vector.broadcast %5 : vector<8x1xf32> to vector<8x239xf32>
    %7 = arith.mulf %4, %6 : vector<8x239xf32>
    %8 = vector.extract_strided_slice %1 {offsets = [0, 1], sizes = [8, 239], strides = [1, 1]} : vector<8x256xf32> to vector<8x239xf32>
    %9 = vector.extract_strided_slice %2 {offsets = [0, 2], sizes = [8, 1], strides = [1, 1]} : vector<8x5xf32> to vector<8x1xf32>
    %10 = arith.maximumf %4, %8 : vector<8x239xf32>
    %11 = vector.broadcast %9 : vector<8x1xf32> to vector<8x239xf32>
    %12 = arith.mulf %8, %11 : vector<8x239xf32>
    %13 = arith.addf %7, %12 : vector<8x239xf32>
    %14 = vector.extract_strided_slice %1 {offsets = [0, 16], sizes = [8, 239], strides = [1, 1]} : vector<8x256xf32> to vector<8x239xf32>
    %15 = vector.extract_strided_slice %2 {offsets = [0, 3], sizes = [8, 1], strides = [1, 1]} : vector<8x5xf32> to vector<8x1xf32>
    %16 = arith.maximumf %10, %14 : vector<8x239xf32>
    %17 = vector.broadcast %15 : vector<8x1xf32> to vector<8x239xf32>
    %18 = arith.mulf %14, %17 : vector<8x239xf32>
    %19 = arith.addf %13, %18 : vector<8x239xf32>
    %20 = vector.extract_strided_slice %1 {offsets = [0, 17], sizes = [8, 239], strides = [1, 1]} : vector<8x256xf32> to vector<8x239xf32>
    %21 = vector.extract_strided_slice %2 {offsets = [0, 4], sizes = [8, 1], strides = [1, 1]} : vector<8x5xf32> to vector<8x1xf32>
    %22 = arith.maximumf %16, %20 : vector<8x239xf32>
    %23 = vector.broadcast %21 : vector<8x1xf32> to vector<8x239xf32>
    %24 = arith.mulf %20, %23 : vector<8x239xf32>
    %25 = arith.addf %19, %24 : vector<8x239xf32>
    %26 = vector.broadcast %3 : vector<8x1xf32> to vector<8x239xf32>
    %27 = arith.mulf %26, %22 : vector<8x239xf32>
    %28 = arith.addf %27, %25 : vector<8x239xf32>
    %c0_4 = arith.constant 0 : index
    %c0_5 = arith.constant 0 : index
    %29 = vector.load %arg4[%c0_4, %c0_5] : memref<239x64xbf16, #tpu.memory_space<vmem>>, vector<239x64xbf16>
    %30 = arith.truncf %28 : vector<8x239xf32> to vector<8x239xbf16>
    %31 = arith.extf %30 : vector<8x239xbf16> to vector<8x239xf32>
    %32 = arith.subf %28, %31 : vector<8x239xf32>
    %33 = tpu.concatenate %28, %32 in 0 : vector<8x239xf32>, vector<8x239xf32> -> vector<16x239xf32>
    %34 = arith.truncf %33 : vector<16x239xf32> to vector<16x239xbf16>
    %cst = arith.constant dense<0.000000e+00> : vector<16x64xf32>
    %35 = tpu.matmul %34, %29, %cst {dimension_numbers = #tpu.dot_dimension_numbers<[1], [0], [0], [1], [0, 0, 1, 1], [], []>} : vector<16x239xbf16>, vector<239x64xbf16>, vector<16x64xf32> -> vector<16x64xf32>
    %36 = vector.extract_strided_slice %35 {offsets = [0, 0], sizes = [8, 64], strides = [1, 1]} : vector<16x64xf32> to vector<8x64xf32>
    %37 = vector.extract_strided_slice %35 {offsets = [8, 0], sizes = [8, 64], strides = [1, 1]} : vector<16x64xf32> to vector<8x64xf32>
    %38 = arith.addf %36, %37 : vector<8x64xf32>
    %c0_6 = arith.constant 0 : index
    %c0_7 = arith.constant 0 : index
    %c0_8 = arith.constant 0 : index
    %39 = vector.load %arg5[%c0_6, %c0_7, %c0_8] : memref<1x8x64xf32, #tpu.memory_space<vmem>>, vector<1x8x64xf32>
    %40 = vector.shape_cast %39 : vector<1x8x64xf32> to vector<8x64xf32>
    %41 = vector.shape_cast %38 : vector<8x64xf32> to vector<1x8x64xf32>
    tpu.vector_store %arg5[%c0_6, %c0_7, %c0_8], %41 {strides = array<i32>} : memref<1x8x64xf32, #tpu.memory_space<vmem>>, vector<1x8x64xf32>,
    return
  }
  func.func @transform_0(%arg0: i32, %arg1: i32) -> (i32, i32, i32) {
    %c0_i32 = arith.constant 0 : i32
    %c0_i32_0 = arith.constant 0 : i32
    return %arg0, %arg1, %c0_i32 : i32, i32, i32
  }
  func.func @transform_1(%arg0: i32, %arg1: i32) -> (i32, i32) {
    %c0_i32 = arith.constant 0 : i32
    %c0_i32_0 = arith.constant 0 : i32
    return %arg1, %c0_i32 : i32, i32
  }
  func.func @transform_2(%arg0: i32, %arg1: i32) -> (i32, i32) {
    %c0_i32 = arith.constant 0 : i32
    %c0_i32_0 = arith.constant 0 : i32
    %c0_i32_1 = arith.constant 0 : i32
    return %c0_i32, %c0_i32_0 : i32, i32
  }
  func.func @transform_3(%arg0: i32, %arg1: i32) -> (i32, i32, i32) {
    %c0_i32 = arith.constant 0 : i32
    %c0_i32_0 = arith.constant 0 : i32
    return %arg0, %arg1, %c0_i32 : i32, i32, i32
  }
}

</mosaic_0001>

<bundles_post_ra>
// kernel: tpu_custom_call.1
= control target key start
LH: loop header
LB: loop body
LE: loop exit
PB: predicated region body
PF: predicated region fallthrough
CT: control target
= control target key end

     0   :  { %8 = vsyncpa [#allocation3], 0  ;;  %s1029_s0 = inlined_call_operand.vmem [shape: f32[2,8,256], index: 0, kind: input, shape index: {}]   ;;  %s1030_s1 = inlined_call_operand.vmem [shape: f32[8,5], index: 1, kind: input, shape index: {}]   ;;  %s1031_s2 = inlined_call_operand.vmem [shape: bf16[239,64], index: 2, kind: input, shape index: {}]   ;;  %s1032_s3 = inlined_call_operand.hbm [shape: f32[2,8,64], index: 3, kind: output, shape index: {}]  }
   0x1   :  { %10 = vsyncpa [#allocation3 + $0x1], 0  ;;  %s861_s12 = smov 0   ;;  %s863_s13 = smov 0  }
   0x2   :  { %s865_s14 = smov 0   ;;  %s867_s15 = smov 0  }
   0x3   :  { %s869_s16 = smov 0   ;;  %s871_s17 = smov 0  }
   0x4 LB: > { %s592_s18 = sadd.s32 4294967295, %s830_s17   ;;  %s593_s19 = sadd.s32 4294967294, %s830_s17   ;;  %s830_s17 = sphi %s871_s17, %s16_s17   ;;  %s826_s16 = sphi %s869_s16, %s1039_s16   ;;  %s822_s15 = sphi %s867_s15, %s1038_s15   ;;  %s818_s14 = sphi %s865_s14, %s1037_s14   ;;  %s814_s13 = sphi %s863_s13, %s1036_s13   ;;  %s810_s12 = sphi %s861_s12, %s1035_s12  }
   0x5   : > { %s28_s20 = sadd.s32 1, %s826_s16  ;;  %s112_s21 = sadd.s32 1, %s818_s14 }
   0x6   : > { %p30_p0 = scmp.ge.s32.totalorder %s28_s20, 2  ;;  %p122_p1 = scmp.ne.s32.totalorder %s818_s14, %s814_s13 }
   0x7   : > { %p123_p2 = scmp.eq.s32.totalorder %s592_s18, 1  ;;  %p128_p3 = scmp.ne.s32.totalorder %s814_s13, %s810_s12 }
   0x8   : > { %s1041_s20 = smov (%p30_p0, %s28_s20), 0  ;;  %p129_p5 = scmp.eq.s32.totalorder %s593_s19, 1 }
   0x9   : > { %p901_p4 = por %p123_p2, %p122_p1  ;;  %s107_s23 = ssub.s32 %s826_s16, %s1041_s20 }
   0xa   : > { %p597_p6 = scmp.ge.s32.totalorder %s830_s17, 1  ;;  %p110_p7 = scmp.eq.s32.totalorder %s107_s23, 0 }
   0xb   : > { %p908_p8 = por %p129_p5, %p128_p3  ;;  %p169_p9 = scmp.lt.s32.totalorder %s830_s17, 3 }
   0xc   : > { %s914_s25 = scalar_select %p110_p7, %s818_s14, %s112_s21  }
   0xd   : > { %p170_p10 = pnand %p597_p6, %p169_p9 }
   0xe   : > { %p201_p11 = scmp.lt.s32.totalorder (!%p170_p10), %s822_s15, 1  ;;  %s835_s6 = smov (!%p170_p10), 127  }
   0xf   : > { %173 = sbr.rel (%p170_p10) target bundleno = 425 (0x1a9), region = 32  ;;  %s837_s7 = smov (!%p170_p10), 112  }
  0x10   : > { %s838_s8 = smov (!%p170_p10), 111  }
  0x14   : > { %v217_v0 = vld [vmem:[%s1030_s1] sm:$0xff]  ;;  %v832_v1 = vmov 2   ;;  %v833_v2 = vmov 4   ;;  %s202_s28 = scalar_select %p201_p11, %s822_s15, 1  ;;  %v834_v3 = vmov 1   ;;  %v836_v6 = vmov 3  }
  0x15   : > { %746 = vset.pattern.permute.xlu0 %v832_v1  ;;  %748 = vset.pattern.permute.xlu1 %v833_v2  ;;  %v839_v7 = vmov 0   ;;  %v674_v17 = vld [vmem:[%s1031_s2 + $0x38] sm:$0xff]  ;;  %vm445_vm0 = vcmask 1046528   ;;  %v681_v19 = vld [vmem:[%s1031_s2 + $0x70] sm:$0xff]  ;;  %vm446_vm1 = vcmask 1047552   ;;  %v840_v20 = vmov 65535  }
  0x16   : > { %238 = vperm.xlu0 %746, %v217_v0   ;;  %292 = vperm.xlu1 %748, %v217_v0   ;;  %s666_s29 = sshll.u32 %s202_s28, 4  ;;  %v447_v21 = vsel %vm445_vm0, 4294967295, %v840_v20  ;;  %v673_v23 = vld [vmem:[%s1031_s2 + $0x30] sm:$0xff]  ;;  %v672_v25 = vld [vmem:[%s1031_s2 + $0x28] sm:$0xff]  ;;  %v671_v29 = vld [vmem:[%s1031_s2 + $0x20] sm:$0xff]  ;;  %vm231_vm2 = vcmask 1039360  }
  0x17   : > { %749 = vset.pattern.permute.xlu2 %v834_v3  ;;  %s209_s5 = scalar_lea.vmem %s1029_s0, %s666_s29  ;;  %452 = vmatpush.bf16.msra.mxu0 %v674_v17  ;;  %v448_v22 = vsel %vm446_vm1, %v447_v21, 0  ;;  %v680_v26 = vld [vmem:[%s1031_s2 + $0x68] sm:$0xff]  ;;  %v679_v30 = vld [vmem:[%s1031_s2 + $0x60] sm:$0xff]  ;;  %v670_v31 = vld [vmem:[%s1031_s2 + $0x18] sm:$0xff]  ;;  %vm258_vm3 = vcmask 916480   ;;  %vm285_vm4 = vcmask 908288  }
  0x18   : > { %v924_v4 = vld [vmem:[%s209_s5 + $0x8] sm:$0xff]  ;;  %v926_v5 = vld [vmem:[%s209_s5] sm:$0xff]  ;;  %v450_v24 = vand.u32 %v681_v19, %v448_v22  ;;  %v678_v32 = vld [vmem:[%s1031_s2 + $0x58] sm:$0xff]  ;;  %s198_s5 = sand.u32 1, %s814_s13   ;;  %vm481_vm5 = vcmask 523264   ;;  %s772_s28 = scalar_lea.hbm %s1032_s3, 16 }
  0x19   : > { %229 = vrot.lane.b32.xlu2 %v924_v4, %s835_s6  ;;  %v669_v34 = vld [vmem:[%s1031_s2 + $0x10] sm:$0xff]  ;;  %v668_v37 = vld [vmem:[%s1031_s2 + $0x8] sm:$0xff]  ;;  %v667_v39 = vld [vmem:[%s1031_s2] sm:$0xff]  ;;  %s484_s21 = scalar_lea.sflag [#allocation3], %s198_s5 }
  0x1a   : > { %467 = vmatpush.bf16.msra.mxu1 %v450_v24  ;;  %v677_v35 = vld [vmem:[%s1031_s2 + $0x50] sm:$0xff]  ;;  %v676_v38 = vld [vmem:[%s1031_s2 + $0x48] sm:$0xff]  ;;  %v675_v40 = vld [vmem:[%s1031_s2 + $0x40] sm:$0xff] }
  0x1b   : > { %453 = vmatpush.bf16.msra.mxu0 %v673_v23 }
  0x1e   : > { %747 = vset.pattern.permute.xlu0 %v836_v6  ;;  %227 = vrot.lane.b32.xlu1 %v926_v5, %s835_s6 }
  0x1f   : > { %265 = vperm.xlu0 %747, %v217_v0   ;;  %454 = vmatpush.bf16.msra.mxu0 %v672_v25 }
  0x20   : > { %468 = vmatpush.bf16.msra.mxu1 %v680_v26 }
  0x21   : > { %220 = vperm.xlu2 %749, %v217_v0  }
  0x23   : > { %455 = vmatpush.bf16.msra.mxu0 %v671_v29 }
  0x24   : > { %469 = vmatpush.bf16.msra.mxu1 %v679_v30 }
  0x26   : > { %256 = vrot.lane.b32.xlu1 %v924_v4, %s837_s7 }
  0x27   : > { %254 = vrot.lane.b32.xlu0 %v926_v5, %s837_s7  ;;  %456 = vmatpush.bf16.msra.mxu0 %v670_v31 }
  0x28   : > { %751 = vset.pattern.permute.xlu0 %v839_v7  ;;  %470 = vmatpush.bf16.msra.mxu1 %v678_v32 }
  0x29   : > { %283 = vrot.lane.b32.xlu2 %v924_v4, %s838_s8 }
  0x2a   : > { %750 = vset.pattern.permute.xlu2 %v839_v7 }
  0x2b   : > { %457 = vmatpush.bf16.msra.mxu0 %v669_v34 }
  0x2c   : > { %471 = vmatpush.bf16.msra.mxu1 %v677_v35 }
  0x2e   : > { %281 = vrot.lane.b32.xlu1 %v926_v5, %s838_s8 }
  0x2f   : > { %458 = vmatpush.bf16.msra.mxu0 %v668_v37 }
  0x30   : > { %472 = vmatpush.bf16.msra.mxu1 %v676_v38 }
  0x33   : > { %459 = vmatpush.bf16.msra.mxu0 %v667_v39 }
  0x34   : > { %473 = vmatpush.bf16.msra.mxu1 %v675_v40 }
  0x73   : > { %v230_v18 = vpop.permute.xlu2 %229 }
  0x74   : > { %v236_v48 = vmax.f32 %v924_v4, %v230_v18 }
  0x7b   : > { %v221_v27 = vpop.permute.xlu2 %220 }
  0x7c   : > { %v224_v47 = vmul.f32 %v221_v27, %v924_v4  ;;  %v223_v54 = vmul.f32 %v221_v27, %v926_v5 }
  0x83   : > { %v284_v33 = vpop.permute.xlu2 %283 }
  0x88   : > { %v239_v8 = vpop.permute.xlu0 %238  ;;  %v293_v11 = vpop.permute.xlu1 %292 }
  0x89   : > { %v241_v9 = vmul.f32 %v239_v8, %v926_v5  ;;  %v242_v10 = vmul.f32 %v239_v8, %v924_v4  ;;  %v296_v12 = vmul.f32 %v293_v11, %v924_v4  ;;  %v295_v16 = vmul.f32 %v293_v11, %v926_v5 }
  0x8b   : > { %247 = vrot.lane.b32.xlu2 %v242_v10, %s835_s6  ;;  %245 = vrot.lane.b32.xlu1 %v241_v9, %s835_s6  ;;  %s598_s6 = sshll.u32 %s198_s5, 3 }
  0x8c   : > { %s200_s11 = scalar_lea.vmem [#allocation2], %s598_s6 }
  0x8d   : > { %s497_s18 = sshll.u32 %s200_s11, 4  ;;  %s498_s18 = int_to_ptr.vmem [resolvable:$true] %s497_s18 }
  0x90   : > { %v228_v28 = vpop.permute.xlu1 %227 }
  0x91   : > { %v266_v13 = vpop.permute.xlu0 %265  ;;  %v232_v44 = vsel %vm231_vm2, %v228_v28, %v230_v18 }
  0x92   : > { %v268_v14 = vmul.f32 %v266_v13, %v926_v5  ;;  %v269_v15 = vmul.f32 %v266_v13, %v924_v4  ;;  %v235_v49 = vmax.f32 %v926_v5, %v232_v44 }
  0x93   : > { %301 = vrot.lane.b32.xlu1 %v296_v12, %s838_s8 }
  0x94   : > { %274 = vrot.lane.b32.xlu0 %v269_v15, %s837_s7  ;;  %272 = vrot.lane.b32.xlu2 %v268_v14, %s837_s7  ;;  %s663_s7 = sshll.u32 %s822_s15, 3 }
  0x95   : > { %s495_s10 = scalar_lea.hbm %s1032_s3, %s663_s7 }
  0x96   : > { %s499_s19 = sshll.u32 %s495_s10, 4  ;;  %s500_s19 = int_to_ptr.hbm [resolvable:$true] %s499_s19 }
  0x97   : > { %s766_s23 = sshra.s32 %s500_s19, 4  ;;  %s767_s23 = int_to_ptr.hbm [resolvable:$true] %s766_s23 }
  0x98   : > { %v257_v36 = vpop.permute.xlu1 %256  ;;  %s768_s15 = scalar_lea.hbm %s767_s23, 8  ;;  %p773_p1 = scmp.lt.s32.totalorder %s767_s23, %s1032_s3 }
  0x99   : > { %v255_v43 = vpop.permute.xlu0 %254  ;;  %v263_v55 = vmax.f32 %v236_v48, %v257_v36  ;;  %p769_p12 = scmp.ne.s32.totalorder %s767_s23, %s768_s15  ;;  %p774_p2 = scmp.lt.s32.totalorder %s772_s28, %s768_s15 }
  0x9a   : > { %v259_v51 = vsel %vm258_vm3, %v255_v43, %v257_v36 }
  0x9b   : > { %v262_v56 = vmax.f32 %v235_v49, %v259_v51  ;;  %p770_p13 = pnand %p769_p12, %p901_p4  ;;  %p775_p3 = por %p774_p2, %p773_p1 }
  0x9c   : > { %299 = vrot.lane.b32.xlu0 %v295_v16, %s838_s8  ;;  %309 = vperm.xlu2 %750, %v217_v0   ;;  %v290_v0 = vmax.f32 %v263_v55, %v284_v33 }
  0x9d   : > { %p771_p0 = pneg %p770_p13 }
  0x9f   : > { %p776_p5 = pnand %p775_p3, %p771_p0 }
  0xa0   : > { %v282_v42 = vpop.permute.xlu1 %281 }
  0xa1   : > { %v286_v58 = vsel %vm285_vm4, %v282_v42, %v284_v33 }
  0xa2   : > { %v289_v63 = vmax.f32 %v262_v56, %v286_v58 }
  0xe5   : > { %v248_v41 = vpop.permute.xlu2 %247 }
  0xe6   : > { %v253_v52 = vadd.f32 %v248_v41, %v224_v47 }
  0xee   : > { %v273_v45 = vpop.permute.xlu2 %272 }
  0xf6   : > { %v310_v62 = vpop.permute.xlu2 %309 }
  0xf7   : > { %v312_v6 = vmul.f32 %v310_v62, %v289_v63  ;;  %v313_v7 = vmul.f32 %v310_v62, %v290_v0 }
  0xfd   : > { %v246_v46 = vpop.permute.xlu1 %245 }
  0xfe   : > { %v249_v53 = vsel %vm231_vm2, %v246_v46, %v248_v41 }
  0xff   : > { %v252_v61 = vadd.f32 %v249_v53, %v223_v54 }
 0x105   : > { %v302_v60 = vpop.permute.xlu1 %301 }
 0x106   : > { %v275_v50 = vpop.permute.xlu0 %274 }
 0x107   : > { %v280_v57 = vadd.f32 %v275_v50, %v253_v52  ;;  %v276_v59 = vsel %vm258_vm3, %v273_v45, %v275_v50 }
 0x108   : > { %v279_v1 = vadd.f32 %v276_v59, %v252_v61 }
 0x109   : > { %v307_v2 = vadd.f32 %v302_v60, %v280_v57 }
 0x10b   : > { %v315_v8 = vadd.f32 %v313_v7, %v307_v2 }
 0x10e   : > { %v300_v3 = vpop.permute.xlu0 %299 }
 0x10f   : > { %v303_v4 = vsel %vm285_vm4, %v300_v3, %v302_v60 }
 0x110   : > { %v306_v5 = vadd.f32 %v303_v4, %v279_v1 }
 0x112   : > { %v314_v9 = vadd.f32 %v312_v6, %v306_v5 }
 0x114   : > { %v346_v10 = vpack.c.bf16 %v315_v8, %v314_v9 }
 0x116   : > { %v347_v11 = vunpack.c.l.bf16 %v346_v10  ;;  %v348_v12 = vunpack.c.h.bf16 %v346_v10 }
 0x118   : > { %v349_v13 = vsub.f32 %v314_v9, %v347_v11  ;;  %v350_v14 = vsub.f32 %v315_v8, %v348_v12 }
 0x11a   : > { %v351_v15 = vpack.c.bf16 %v349_v13, %v314_v9  ;;  %v352_v16 = vpack.c.bf16 %v350_v14, %v315_v8 }
 0x11c   : > { %460 = vmatmul.bf16.vlgmr.msra.gmra.mxu0 %v351_v15  ;;  %661 = vmatmul.msk.bf16.vlgmr.msra.gmra.mxu1 %vm285_vm4, %v352_v16 }
 0x199   : > { %v461_v17 = vpop.f32.mrf.mxu0  ;;  %v475_v18 = vpop.f32.mrf.mxu1 }
 0x19a   : > { %v476_v21 = vadd.f32 %v475_v18, %v461_v17 }
 0x1a1   : > { %v463_v19 = vpop.f32.mrf.mxu0  ;;  %v477_v20 = vpop.f32.mrf.mxu1 }
 0x1a2   : > { %v478_v22 = vadd.f32 %v477_v20, %v463_v19 }
 0x1a4   : > { %v480_v23 = vadd.f32 %v478_v22, %v476_v21 }
 0x1a6   : > { %482 = vst.msk [vmem:[%s200_s11] sm:$0xff] %vm481_vm5, %v480_v23 }
 0x1a7   : > { %779 = shalt.err (!%p776_p5)
}
 0x1a8   : > { %682 = dma.vmem_to_hbm [thread:$0]  (%p901_p4), %s498_s18, 128, %s500_s19, %s484_s21  }
 0x1a9 PF: > { %p688_p6 = scmp.ge.s32.totalorder %s830_s17, 2  ;;  %s511_s4 = sand.u32 1, %s810_s12  }
 0x1aa   : > { %s512_s5 = scalar_lea.sflag [#allocation3], %s511_s4 }
 0x1ab   : > { %p685_p7 = pnand %p688_p6, %p908_p8 }
 0x1ad   : > { %p686_p9 = pneg %p685_p7 }
 0x1af   : > { %805 = dma.done.wait (%p686_p9), %s512_s5, 128  }
 0x1b0   : > { %807 = vsyncadd (%p686_p9), %s512_s5, 4294967168  ;;  %s16_s17 = sadd.s32 1, %s830_s17   ;;  %s1035_s12 = smov %s814_s13 }
 0x1b1   : > { %p13_p10 = scmp.ge.s32.totalorder %s16_s17, 4   ;;  %s1036_s13 = smov %s818_s14 }
 0x1b2   : > { %s1037_s14 = smov %s914_s25  ;;  %s1038_s15 = smov %s826_s16 }
 0x1b3   : > { %s1039_s16 = smov %s1041_s20  ;;  %15 = sbr.rel (!%p13_p10) target bundleno = 4 (0x4), region = 70 }
 0x1b8   :  { %518 = vsyncpa [#allocation3], 1 }
 0x1b9   :  { %520 = vsyncpa [#allocation3 + $0x1], 1 }

</bundles_post_ra>
